<compile_context>
chip_gen: v7x
topology: tpu7x:2x2x1
jax: 0.10.0
libtpu: 0.0.40
codegen_flags: <defaults>
</compile_context>

<pallas_src>
import functools

import jax
import jax.numpy as jnp
from jax import lax
from jax.experimental import pallas as pl
from jax.experimental.pallas import tpu as pltpu


def _round_up(x, m):
    return ((x + m - 1) // m) * m


def _choose_tile_n(n):
    """Batch tile: multiple-of-8 divisor of n, preferring >= 2 tiles so the
    'parallel' axis can be split across v7x's two TensorCores; fall back to
    the whole batch (a block dim equal to the full array dim is always legal)."""
    if n % 8 != 0:
        return n
    for t in (128, 64, 32, 16, 8):
        if n % t == 0 and n // t >= 2:
            return t
    return n


def _choose_tile_c(c, tile_n, hw, itemsize, x_stream_budget):
    """Channel tile: multiple-of-8 divisor of c whose double-buffered x tile
    fits the per-device VMEM budget; fall back to the full channel dim."""
    if c % 8 != 0:
        return c
    lanes = _round_up(hw, 128)                 # VMEM lane padding of the HW axis
    row_bytes = tile_n * lanes * itemsize
    max_rows = max(8, x_stream_budget // (2 * row_bytes))
    best = 8
    t = 8
    while t <= c:
        if c % t == 0 and t <= max_rows:
            best = t
        t += 8
    return best


def _gap_linear_kernel(x_ref, w_ref, b_ref, o_ref, acc_ref, *, inv_hw):
    """Grid = (N_tiles, C_tiles); C is the (arbitrary) reduction axis.

    x_ref:   (TILE_N, TILE_C, HW)   NCHW activations, HW on the lane axis
    w_ref:   (TILE_C, E_pad)        linear-weight slice (pre-transposed)
    b_ref:   (1, E_pad)             linear bias
    o_ref:   (TILE_N, E_pad)        y = GAP(x) @ W + b
    acc_ref: (TILE_N, E_pad) f32    running partial-matmul accumulator
    """
    c = pl.program_id(1)

    @pl.when(c == 0)
    def _():
        acc_ref[...] = jnp.zeros_like(acc_ref)

    # Per-channel spatial mean for this C tile (XLU lane reduce, f32 accum),
    # then one partial MXU matmul against the matching weight slice.
    feat = jnp.sum(x_ref[...].astype(jnp.float32), axis=-1) * inv_hw
    acc_ref[...] += jnp.dot(feat, w_ref[...],
                            preferred_element_type=jnp.float32,
                            precision=lax.Precision.HIGHEST)

    @pl.when(c == pl.num_programs(1) - 1)
    def _():
        o_ref[...] = (acc_ref[...] + b_ref[...]).astype(o_ref.dtype)


def _batchnorm_kernel(y_ref, gamma_ref, beta_ref, o_ref):
    """BatchNorm1d, training-mode batch statistics (biased var), eps=1e-5."""
    y = y_ref[...].astype(jnp.float32)
    mu = jnp.mean(y, axis=0, keepdims=True)
    var = jnp.mean((y - mu) * (y - mu), axis=0, keepdims=True)
    y_hat = (y - mu) * lax.rsqrt(var + 1e-5)
    o_ref[...] = (gamma_ref[...] * y_hat + beta_ref[...]).astype(o_ref.dtype)


def encoder_cnn_forward(images, w, b, gamma, beta, *, tile_n=None, tile_c=None):
    """images: (N, C, H, W) float32/bf16. Returns (N, E) float32."""
    N, C, H, W = images.shape
    E = w.shape[0]
    HW = H * W
    E_pad = _round_up(E, 128)

    try:
        vmem_cap = int(pltpu.get_tpu_info().vmem_capacity_bytes)
    except Exception:
        vmem_cap = 64 * 1024 * 1024            # conservative fallback (v7x per-TC)

    x = images.reshape(N, C, HW)               # free reshape: NO transpose/pad copy
    itemsize = x.dtype.itemsize                # bf16 activations halve the HBM stream

    TILE_N = tile_n if tile_n is not None else _choose_tile_n(N)
    x_budget = int(vmem_cap * 0.4)             # double-buffered x-stream budget
    TILE_C = tile_c if tile_c is not None else _choose_tile_c(
        C, TILE_N, HW, itemsize, x_budget)
    assert N % TILE_N == 0 and C % TILE_C == 0

    # Tiny parameter pads only (E -> E_pad); the big activation tensor is untouched.
    w_t = jnp.pad(w.T.astype(jnp.float32), ((0, 0), (0, E_pad - E)))   # (C, E_pad)
    b_p = jnp.pad(b.astype(jnp.float32), (0, E_pad - E)).reshape(1, E_pad)
    g_p = jnp.pad(gamma.astype(jnp.float32), (0, E_pad - E)).reshape(1, E_pad)
    beta_p = jnp.pad(beta.astype(jnp.float32), (0, E_pad - E)).reshape(1, E_pad)

    grid = (N // TILE_N, C // TILE_C)

    lanes = _round_up(HW, 128)
    vmem_est = (2 * TILE_N * TILE_C * lanes * itemsize   # x tiles (double-buffered)
                + 2 * TILE_C * E_pad * 4                 # streamed weight tiles
                + 2 * TILE_N * E_pad * 4                 # output tile
                + TILE_N * E_pad * 4                     # accumulator scratch
                + 4 * E_pad * 4)                         # bias
    vmem_limit = int(min(vmem_cap * 0.9,
                         max(vmem_est + 4 * 1024 * 1024, 32 * 1024 * 1024)))

    cost = pl.CostEstimate(
        flops=N * C * HW + 2 * N * C * E_pad,
        transcendentals=0,
        bytes_accessed=N * C * HW * itemsize + (C * E_pad + N * E_pad) * 4,
    )

    y = pl.pallas_call(
        functools.partial(_gap_linear_kernel, inv_hw=1.0 / float(HW)),
        out_shape=jax.ShapeDtypeStruct((N, E_pad), jnp.float32),
        grid=grid,
        in_specs=[
            pl.BlockSpec((TILE_N, TILE_C, HW), lambda n, c: (n, c, 0)),
            pl.BlockSpec((TILE_C, E_pad), lambda n, c: (c, 0)),
            pl.BlockSpec((1, E_pad), lambda n, c: (0, 0)),
        ],
        out_specs=pl.BlockSpec((TILE_N, E_pad), lambda n, c: (n, 0)),
        scratch_shapes=[pltpu.VMEM((TILE_N, E_pad), jnp.float32)],
        compiler_params=pltpu.CompilerParams(
            dimension_semantics=("parallel", "arbitrary"),
            vmem_limit_bytes=vmem_limit),
        cost_estimate=cost,
    )(x, w_t, b_p)

    # y already has exactly N rows (no padded batch rows -> no extra slice copy).
    out_p = pl.pallas_call(
        _batchnorm_kernel,
        out_shape=jax.ShapeDtypeStruct((N, E_pad), jnp.float32),
        grid=(1,),
        in_specs=[
            pl.BlockSpec((N, E_pad), lambda i: (0, 0)),
            pl.BlockSpec((1, E_pad), lambda i: (0, 0)),
            pl.BlockSpec((1, E_pad), lambda i: (0, 0)),
        ],
        out_specs=pl.BlockSpec((N, E_pad), lambda i: (0, 0)),
        compiler_params=pltpu.CompilerParams(
            dimension_semantics=("arbitrary",)),
    )(y, g_p, beta_p)

    return out_p[:, :E]


def reference_forward(images, w, b, gamma, beta):
    """Pure-JAX reference mirroring the PyTorch semantics."""
    feat = jnp.mean(images, axis=(2, 3))                      # GAP -> (N, C)
    y = feat @ w.T + b                                        # Linear
    mu = jnp.mean(y, axis=0, keepdims=True)
    var = jnp.mean((y - mu) ** 2, axis=0, keepdims=True)      # biased var
    return gamma * (y - mu) / jnp.sqrt(var + 1e-5) + beta


if __name__ == "__main__":
    # --- case 1: small shapes consistent with the module's forward ----------
    N, C, H, W = 2, 4, 16, 16
    E = 32

    key = jax.random.PRNGKey(0)
    k_img, k_w = jax.random.split(key)
    images = jax.random.normal(k_img, (N, C, H, W), dtype=jnp.float32)
    # init_weights(): linear.weight ~ N(0, 0.02), linear.bias = 0
    w = 0.02 * jax.random.normal(k_w, (E, C), dtype=jnp.float32)
    b = jnp.zeros((E,), dtype=jnp.float32)
    # BatchNorm1d default affine init: weight=1, bias=0
    gamma = jnp.ones((E,), dtype=jnp.float32)
    beta = jnp.zeros((E,), dtype=jnp.float32)

    out = jax.block_until_ready(encoder_cnn_forward(images, w, b, gamma, beta))
    ref = reference_forward(images, w, b, gamma, beta)
    assert out.shape == (N, E)
    assert jnp.allclose(out, ref, atol=1e-4, rtol=1e-4)

    # --- case 2: exercise the multi-tile N/C grid paths (still tiny) --------
    N2, C2, H2, W2, E2 = 16, 16, 8, 8, 32
    k1, k2 = jax.random.split(jax.random.PRNGKey(1))
    images2 = jax.random.normal(k1, (N2, C2, H2, W2), dtype=jnp.float32)
    w2 = 0.02 * jax.random.normal(k2, (E2, C2), dtype=jnp.float32)
    b2 = jnp.zeros((E2,), dtype=jnp.float32)
    gamma2 = jnp.ones((E2,), dtype=jnp.float32)
    beta2 = jnp.zeros((E2,), dtype=jnp.float32)
    out2 = jax.block_until_ready(
        encoder_cnn_forward(images2, w2, b2, gamma2, beta2, tile_n=8, tile_c=8))
    ref2 = reference_forward(images2, w2, b2, gamma2, beta2)
    assert out2.shape == (N2, E2)
    assert jnp.allclose(out2, ref2, atol=1e-4, rtol=1e-4)

    print("KERNEL_OK")
</pallas_src>

<mosaic_0001>
module attributes {stable_mosaic.version = 11 : i64} {
  func.func @_gap_linear_kernel(%arg0: i32, %arg1: i32, %arg2: memref<2x4x256xf32, #tpu.memory_space<vmem>>, %arg3: memref<4x128xf32, #tpu.memory_space<vmem>>, %arg4: memref<1x128xf32, #tpu.memory_space<vmem>>, %arg5: memref<2x128xf32, #tpu.memory_space<vmem>>, %arg6: memref<2x128xf32, #tpu.memory_space<vmem>>) attributes {dimension_semantics = [#tpu.dimension_semantics<parallel>, #tpu.dimension_semantics<arbitrary>], iteration_bounds = array<i64: 1, 1>, scalar_prefetch = 0 : i64, scratch_operands = 1 : i64, tpu.core_type = #tpu.core_type<tc>, window_params = [{transform_indices = @transform_0, window_bounds = array<i64: 2, 4, 256>}, {transform_indices = @transform_1, window_bounds = array<i64: 4, 128>}, {pipeline_mode = #tpu.pipeline_mode<synchronous>, transform_indices = @transform_2, window_bounds = array<i64: 1, 128>}, {transform_indices = @transform_3, window_bounds = array<i64: 2, 128>}]} {
    %c0_i32 = arith.constant 0 : i32
    %0 = arith.cmpi eq, %arg1, %c0_i32 : i32
    %1 = arith.extui %0 : i1 to i32
    %c0_i32_0 = arith.constant 0 : i32
    %2 = arith.cmpi ne, %1, %c0_i32_0 : i32
    scf.if %2 {
      %cst_13 = arith.constant 0.000000e+00 : f32
      %15 = vector.broadcast %cst_13 : f32 to vector<2x128xf32>
      %c0_14 = arith.constant 0 : index
      %c0_15 = arith.constant 0 : index
      %16 = vector.load %arg6[%c0_14, %c0_15] : memref<2x128xf32, #tpu.memory_space<vmem>>, vector<2x128xf32>
      tpu.vector_store %arg6[%c0_14, %c0_15], %15 {strides = array<i32>} : memref<2x128xf32, #tpu.memory_space<vmem>>, vector<2x128xf32>,
    } else {
    }
    %c0 = arith.constant 0 : index
    %c0_1 = arith.constant 0 : index
    %c0_2 = arith.constant 0 : index
    %3 = vector.load %arg2[%c0, %c0_1, %c0_2] : memref<2x4x256xf32, #tpu.memory_space<vmem>>, vector<2x4x256xf32>
    %cst = arith.constant dense<0.000000e+00> : vector<2x4xf32>
    %4 = vector.multi_reduction <add>, %3, %cst [2] : vector<2x4x256xf32> to vector<2x4xf32>
    %cst_3 = arith.constant 3.906250e-03 : f32
    %5 = vector.broadcast %cst_3 : f32 to vector<2x4xf32>
    %6 = arith.mulf %4, %5 : vector<2x4xf32>
    %c0_4 = arith.constant 0 : index
    %c0_5 = arith.constant 0 : index
    %7 = vector.load %arg6[%c0_4, %c0_5] : memref<2x128xf32, #tpu.memory_space<vmem>>, vector<2x128xf32>
    %c0_6 = arith.constant 0 : index
    %c0_7 = arith.constant 0 : index
    %8 = vector.load %arg3[%c0_6, %c0_7] : memref<4x128xf32, #tpu.memory_space<vmem>>, vector<4x128xf32>
    %cst_8 = arith.constant dense<0.000000e+00> : vector<2x128xf32>
    %9 = tpu.matmul %6, %8, %cst_8 {dimension_numbers = #tpu.dot_dimension_numbers<[1], [0], [0], [1], [0, 0, 1, 1], [], []>, precision = #tpu.contract_precision<fp32>} : vector<2x4xf32>, vector<4x128xf32>, vector<2x128xf32> -> vector<2x128xf32>
    %10 = arith.addf %7, %9 : vector<2x128xf32>
    %c0_9 = arith.constant 0 : index
    %c0_10 = arith.constant 0 : index
    %11 = vector.load %arg6[%c0_9, %c0_10] : memref<2x128xf32, #tpu.memory_space<vmem>>, vector<2x128xf32>
    tpu.vector_store %arg6[%c0_9, %c0_10], %10 {strides = array<i32>} : memref<2x128xf32, #tpu.memory_space<vmem>>, vector<2x128xf32>,
    %c0_i32_11 = arith.constant 0 : i32
    %12 = arith.cmpi eq, %arg1, %c0_i32_11 : i32
    %13 = arith.extui %12 : i1 to i32
    %c0_i32_12 = arith.constant 0 : i32
    %14 = arith.cmpi ne, %13, %c0_i32_12 : i32
    scf.if %14 {
      %c0_13 = arith.constant 0 : index
      %c0_14 = arith.constant 0 : index
      %15 = vector.load %arg6[%c0_13, %c0_14] : memref<2x128xf32, #tpu.memory_space<vmem>>, vector<2x128xf32>
      %c0_15 = arith.constant 0 : index
      %c0_16 = arith.constant 0 : index
      %16 = vector.load %arg4[%c0_15, %c0_16] : memref<1x128xf32, #tpu.memory_space<vmem>>, vector<1x128xf32>
      %17 = vector.broadcast %16 : vector<1x128xf32> to vector<2x128xf32>
      %18 = arith.addf %15, %17 : vector<2x128xf32>
      %c0_17 = arith.constant 0 : index
      %c0_18 = arith.constant 0 : index
      %19 = vector.load %arg5[%c0_17, %c0_18] : memref<2x128xf32, #tpu.memory_space<vmem>>, vector<2x128xf32>
      tpu.vector_store %arg5[%c0_17, %c0_18], %18 {strides = array<i32>} : memref<2x128xf32, #tpu.memory_space<vmem>>, vector<2x128xf32>,
    } else {
    }
    return
  }
  func.func @transform_0(%arg0: i32, %arg1: i32) -> (i32, i32, i32) {
    %c0_i32 = arith.constant 0 : i32
    %c0_i32_0 = arith.constant 0 : i32
    return %arg0, %arg1, %c0_i32 : i32, i32, i32
  }
  func.func @transform_1(%arg0: i32, %arg1: i32) -> (i32, i32) {
    %c0_i32 = arith.constant 0 : i32
    %c0_i32_0 = arith.constant 0 : i32
    return %arg1, %c0_i32 : i32, i32
  }
  func.func @transform_2(%arg0: i32, %arg1: i32) -> (i32, i32) {
    %c0_i32 = arith.constant 0 : i32
    %c0_i32_0 = arith.constant 0 : i32
    %c0_i32_1 = arith.constant 0 : i32
    return %c0_i32, %c0_i32_0 : i32, i32
  }
  func.func @transform_3(%arg0: i32, %arg1: i32) -> (i32, i32) {
    %c0_i32 = arith.constant 0 : i32
    %c0_i32_0 = arith.constant 0 : i32
    return %arg0, %c0_i32 : i32, i32
  }
}

</mosaic_0001>

<bundles_post_ra>
// kernel: tpu_custom_call.1
= control target key start
LH: loop header
LB: loop body
LE: loop exit
PB: predicated region body
PF: predicated region fallthrough
CT: control target
= control target key end

     0   :  { %8 = vsyncpa [#allocation4], 0  ;;  %s762_s0 = inlined_call_operand.hbm [shape: f32[2,4,256], index: 0, kind: input, shape index: {}]   ;;  %s763_s1 = inlined_call_operand.hbm [shape: f32[4,128], index: 1, kind: input, shape index: {}]   ;;  %s764_s2 = inlined_call_operand.vmem [shape: f32[1,128], index: 2, kind: input, shape index: {}]   ;;  %s765_s3 = inlined_call_operand.hbm [shape: f32[2,128], index: 3, kind: output, shape index: {}]  }
   0x1   :  { %9 = vsyncpa [#allocation7], 0 }
   0x2   :  { %10 = vsyncpa [#allocation5], 0  ;;  %s690_s12 = smov [#allocation3]   ;;  %s618_s16 = scalar_lea.hbm %s762_s0, 256 }
   0x3   :  { %s16_s13 = sshll.u32 %s690_s12, 4  ;;  %p619_p0 = scmp.ne.s32.totalorder %s762_s0, %s618_s16  ;;  %s17_s13 = int_to_ptr.vmem [resolvable:$true] %s16_s13 }
   0x4   :  { %p622_p1 = scmp.lt.u32.totalorder %s618_s16, %s762_s0 }
   0x6   :  { %p624_p2 = pnand %p622_p1, %p619_p0 }
   0x8   :  { %627 = shalt.err (!%p624_p2)
}
   0x9   :  { %s628_s21 = scalar_lea.vmem %s17_s13, 256  ;;  %p633_p4 = scmp.lt.s32.totalorder %s17_s13, %s17_s13 }
   0xa   :  { %p629_p3 = scmp.ne.s32.totalorder %s17_s13, %s628_s21  ;;  %p634_p5 = scmp.lt.s32.totalorder %s628_s21, %s628_s21 }
   0xc   :  { %p635_p6 = por %p634_p5, %p633_p4 }
   0xe   :  { %p636_p7 = pnand %p635_p6, %p629_p3 }
  0x10   :  { %639 = shalt.err (!%p636_p7)
}
  0x11   :  { %s691_s22 = smov 128   ;;  %s692_s23 = smov 8  }
  0x12   :  { %22 = dma.hbm_to_vmem [thread:$0]  %s762_s0, 256, %s17_s13, [#allocation4], %s691_s22, %s691_s22, %s692_s23  }
  0x13   :  { %s693_s26 = smov [#allocation6]   ;;  %s640_s30 = scalar_lea.hbm %s763_s1, 64 }
  0x14   :  { %s29_s27 = sshll.u32 %s693_s26, 4  ;;  %p641_p8 = scmp.ne.s32.totalorder %s763_s1, %s640_s30  ;;  %s30_s27 = int_to_ptr.vmem [resolvable:$true] %s29_s27 }
  0x15   :  { %p644_p9 = scmp.lt.u32.totalorder %s640_s30, %s763_s1 }
  0x17   :  { %p646_p10 = pnand %p644_p9, %p641_p8 }
  0x19   :  { %649 = shalt.err (!%p646_p10)
}
  0x1a   :  { %s650_s8 = scalar_lea.vmem %s30_s27, 64  ;;  %p655_p12 = scmp.lt.s32.totalorder %s30_s27, %s30_s27 }
  0x1b   :  { %p651_p11 = scmp.ne.s32.totalorder %s30_s27, %s650_s8  ;;  %p656_p13 = scmp.lt.s32.totalorder %s650_s8, %s650_s8 }
  0x1d   :  { %p657_p0 = por %p656_p13, %p655_p12 }
  0x1f   :  { %p658_p1 = pnand %p657_p0, %p651_p11 }
  0x21   :  { %661 = shalt.err (!%p658_p1)
}
  0x22   :  { %32 = dma.hbm_to_vmem [thread:$0]  %s763_s1, 64, %s30_s27, [#allocation7]  }
  0x23   :  { %684 = dma.done.wait [#allocation4], 256  }
  0x24   :  { %685 = vsyncadd [#allocation4], 4294967040 }
  0x25   :  { %686 = dma.done.wait [#allocation7], 64  }
  0x26   :  { %687 = vsyncadd [#allocation7], 4294967232  ;;  %vm54_vm0 = vcmask 1043456   ;;  %v46_v0 = vld [vmem:[#allocation3] sm:$0xff]  ;;  %v47_v1 = vld [vmem:[#allocation3 + $0x8] sm:$0xff]  ;;  %v694_v17 = vmov 0.0   ;;  %v71_v18 = vlaneseq }
  0x27   :  { %v50_v2 = vcombine.high %v46_v0, %v46_v0  ;;  %v55_v3 = vsel %vm54_vm0, %v46_v0, 0.0  ;;  %v51_v4 = vcombine.high %v47_v1, %v47_v1  ;;  %v60_v6 = vsel %vm54_vm0, %v47_v1, 0.0  ;;  %v68_v10 = vld [vmem:[#allocation6] sm:$0xf]  ;;  %584 = vmatprep.subr.mxu1 %v694_v17  ;;  %45 = vst [vmem:[#allocation2] sm:$0x3] %v694_v17  ;;  %579 = vmatprep.subr.mxu0 %v694_v17 }
  0x28   :  { %v87_v11 = vsel %vm54_vm0, %v68_v10, 0  ;;  %vm695_vm1 = vmmov 0   ;;  %v72_v19 = vand.u32 127, %v71_v18  ;;  %v74_v20 = vshrl.u32 %v71_v18, 7  ;;  %v566_v54 = vld [vmem:[%s764_s2] ss:$0 sm:$0xff] }
  0x29   :  { %v56_v5 = vsel %vm54_vm0, %v50_v2, 0.0  ;;  %v61_v7 = vsel %vm54_vm0, %v51_v4, 0.0  ;;  %v90_v12 = vand.u32 4294901760, %v87_v11  ;;  %586 = vmatprep.mubr.msk.f32.mxu1 %vm695_vm1, %v694_v17  ;;  %581 = vmatprep.mubr.msk.f32.mxu0 %vm695_vm1, %v694_v17  ;;  %vm81_vm2 = vcmask 1041409   ;;  %s696_s11 = smov [#allocation8]  }
  0x2a   :  { %v57_v8 = vadd.f32 %v56_v5, %v55_v3  ;;  %v62_v9 = vadd.f32 %v61_v7, %v60_v6  ;;  %v75_v22 = vsub.s32 %v72_v19, %v74_v20  ;;  %vm83_vm3 = vcmask 31744   ;;  %s556_s12 = sshll.u32 %s696_s11, 4  ;;  %s557_s12 = int_to_ptr.vmem [resolvable:$true] %s556_s12 }
  0x2b   :  { %v167_v13 = vsub.f32 %v87_v11, %v90_v12  ;;  %580 = vmatpush3.msra.mxu0 %v90_v12  ;;  %s662_s13 = scalar_lea.vmem %s557_s12, 32  ;;  %p667_p3 = scmp.lt.s32.totalorder %s557_s12, %s557_s12 }
  0x2c   :  { %58 = vadd.xlane.f32.xlu0 %v57_v8  ;;  %589 = vmatprep.subr.mxu0 %v694_v17  ;;  %p663_p2 = scmp.ne.s32.totalorder %s557_s12, %s662_s13  ;;  %p668_p4 = scmp.lt.s32.totalorder %s662_s13, %s662_s13 }
  0x2d   :  { %v168_v14 = vand.u32 4294901760, %v167_v13 }
  0x2e   :  { %v67_v51 = vld [vmem:[#allocation2] sm:$0x3]  ;;  %p669_p5 = por %p668_p4, %p667_p3 }
  0x2f   :  { %v169_v15 = vsub.f32 %v167_v13, %v168_v14 }
  0x30   :  { %63 = vadd.xlane.f32.xlu0 %v62_v9  ;;  %p670_p6 = pnand %p669_p5, %p663_p2 }
  0x31   :  { %v170_v16 = vand.u32 4294901760, %v169_v15 }
  0x33   :  { %585 = vmatpush3.msra.mxu1 %v170_v16 }
  0x34   :  { %594 = vmatprep.subr.mxu1 %v694_v17 }
  0xb9   :  { %v59_v21 = vpop.xlane.xlu0 %58 }
  0xba   :  { %v65_v23 = vmul.f32 0.00390625, %v59_v21 }
  0xbc   :  { %v76_v26 = vrot.slane %v65_v23, %v75_v22 }
  0xbd   :  { %v64_v24 = vpop.xlane.xlu0 %63 }
  0xbe   :  { %v66_v25 = vmul.f32 0.00390625, %v64_v24 }
  0xc0   :  { %v80_v27 = vrot.slane %v66_v25, %v75_v22 }
  0xc2   :  { %v82_v28 = vsel %vm81_vm2, %v80_v27, %v76_v26 }
  0xc3   :  { %v84_v29 = vsel %vm83_vm3, %v82_v28, 0 }
  0xc4   :  { %v155_v30 = vand.u32 4294901760, %v84_v29 }
  0xc6   :  { %587 = vmatmul.mubr.f32.vlgmr.msra.gmra.mrb[0].mxu1 %v155_v30  ;;  %v156_v31 = vsub.f32 %v84_v29, %v155_v30 }
  0xc7   :  { %595 = vmatpush3.msra.mxu1 %v90_v12  ;;  %596 = vmatprep.mubr.msk.f32.mxu1 %vm695_vm1, %v694_v17 }
  0xc8   :  { %v157_v32 = vand.u32 4294901760, %v156_v31  ;;  %604 = vmatprep.subr.mxu1 %v694_v17 }
  0xca   :  { %597 = vmatmul.mubr.f32.vlgmr.msra.gmra.mrb[2].mxu1 %v157_v32  ;;  %v158_v33 = vsub.f32 %v156_v31, %v157_v32 }
  0xcb   :  { %605 = vmatpush3.msra.mxu1 %v90_v12  ;;  %606 = vmatprep.mubr.msk.f32.mxu1 %vm695_vm1, %v694_v17 }
  0xcc   :  { %v159_v34 = vand.u32 4294901760, %v158_v33 }
  0xce   :  { %582 = vmatmul.mubr.f32.vlgmr.msra.gmra.mrb[0].mxu0 %v159_v34  ;;  %607 = vmatmul.mubr.f32.vlgmr.msra.gmra.mrb[4].mxu1 %v155_v30 }
  0xcf   :  { %590 = vmatpush3.msra.mxu0 %v167_v13  ;;  %591 = vmatprep.mubr.msk.f32.mxu0 %vm695_vm1, %v694_v17 }
  0xd0   :  { %599 = vmatprep.subr.mxu0 %v694_v17 }
  0xd2   :  { %592 = vmatmul.mubr.f32.vlgmr.msra.gmra.mrb[2].mxu0 %v156_v31 }
  0xd3   :  { %600 = vmatpush3.msra.mxu0 %v168_v14  ;;  %601 = vmatprep.mubr.msk.f32.mxu0 %vm695_vm1, %v694_v17 }
  0xd6   :  { %602 = vmatmul.mubr.f32.vlgmr.msra.gmra.mrb[4].mxu0 %v155_v30 }
 0x199   :  { %v237_v35 = vpop.f32.mrb[0].mxu1 }
 0x19a   :  { %v588_v36 = vpop.f32.mrb[1].mxu1 }
 0x19d   :  { %v385_v37 = vpop.f32.mrb[2].mxu1 }
 0x19e   :  { %v598_v38 = vpop.f32.mrb[3].mxu1 }
 0x1a1   :  { %v161_v39 = vpop.f32.mrb[0].mxu0  ;;  %v531_v40 = vpop.f32.mrb[4].mxu1 }
 0x1a2   :  { %v238_v41 = vadd.f32 %v237_v35, %v161_v39  ;;  %v583_v42 = vpop.f32.mrb[1].mxu0  ;;  %v608_v43 = vpop.f32.mrb[5].mxu1 }
 0x1a5   :  { %v311_v44 = vpop.f32.mrb[2].mxu0 }
 0x1a6   :  { %v312_v45 = vadd.f32 %v311_v44, %v238_v41  ;;  %v593_v46 = vpop.f32.mrb[3].mxu0 }
 0x1a8   :  { %v386_v47 = vadd.f32 %v385_v37, %v312_v45 }
 0x1a9   :  { %v459_v48 = vpop.f32.mrb[4].mxu0 }
 0x1aa   :  { %v460_v49 = vadd.f32 %v459_v48, %v386_v47  ;;  %v603_v50 = vpop.f32.mrb[5].mxu0 }
 0x1ac   :  { %v532_v52 = vadd.f32 %v531_v40, %v460_v49 }
 0x1ae   :  { %v535_v53 = vadd.f32 %v532_v52, %v67_v51 }
 0x1b0   :  { %536 = vst [vmem:[#allocation2] sm:$0x3] %v535_v53 }
 0x1b7   :  { %v540_v55 = vld [vmem:[#allocation2] sm:$0x3] }
 0x1b8   :  { %v548_v56 = vadd.f32 %v566_v54, %v540_v55 }
 0x1ba   :  { %549 = vst [vmem:[#allocation8] sm:$0x3] %v548_v56 }
 0x1bb   :  { %673 = shalt.err (!%p670_p6)
}
 0x1bc   :  { %s674_s16 = scalar_lea.hbm %s765_s3, 32 }
 0x1bd   :  { %p675_p7 = scmp.ne.s32.totalorder %s765_s3, %s674_s16  ;;  %p678_p8 = scmp.lt.u32.totalorder %s674_s16, %s765_s3 }
 0x1bf   :  { %p680_p9 = pnand %p678_p8, %p675_p7 }
 0x1c1   :  { %683 = shalt.err (!%p680_p9)
}
 0x1c2   :  { %559 = dma.vmem_to_hbm [thread:$0]  %s557_s12, 32, %s765_s3, [#allocation5]  }
 0x1c3   :  { %688 = dma.done.wait [#allocation5], 32  }
 0x1c4   :  { %689 = vsyncadd [#allocation5], 4294967264 }
 0x1c5   :  { %563 = vsyncpa [#allocation4], 1 }
 0x1c6   :  { %564 = vsyncpa [#allocation7], 1 }
 0x1c7   :  { %565 = vsyncpa [#allocation5], 1 }

</bundles_post_ra>
